<compile_context>
chip_gen: v7x
topology: tpu7x:2x2x1
jax: 0.10.0
libtpu: 0.0.40
codegen_flags: <defaults>
</compile_context>

<pallas_src>
import jax
import jax.numpy as jnp
from jax.experimental import pallas as pl
from jax.experimental.pallas import tpu as pltpu


def _copy_kernel(x_ref, o_ref):
    # Straight VMEM->VMEM copy of the current tile (identity hot path).
    o_ref[...] = x_ref[...]


def _resolve_shape(total: int, shape):
    """Resolve a single -1 entry in `shape`, PyTorch .view() semantics."""
    shape = list(shape)
    if -1 in shape:
        idx = shape.index(-1)
        known = 1
        for i, s in enumerate(shape):
            if i != idx:
                known *= s
        assert known != 0 and total % known == 0, "cannot resolve -1 in reshape"
        shape[idx] = total // known
    prod = 1
    for s in shape:
        prod *= s
    assert prod == total, f"reshape size mismatch: {shape} vs {total} elements"
    return tuple(shape)


# Sublane pack factor per element size (bytes -> rows packed per sublane pair).
_SUBLANE_PACK = {1: 32, 2: 16, 4: 8, 8: 8}

_LANE = 128


def pallas_reshape(x, shape, *, max_tile_rows=1024):
    """Equivalent of torch `x.view(shape)`; data copy done in Pallas when the
    flattened tensor forms a clean lane-dense slab, metadata-only otherwise."""
    total = x.size
    out_shape = _resolve_shape(total, shape)

    itemsize = jnp.dtype(x.dtype).itemsize
    sub = _SUBLANE_PACK.get(itemsize, 8)

    # Fallback: reshape is pure metadata in XLA; padding+copy+slice would only
    # add HBM traffic for ragged or empty inputs.
    # TODO(synk): torch .view() contiguity-failure semantics are not replicated.
    if total == 0 or total % (sub * _LANE) != 0:
        return jnp.reshape(x, out_shape)

    rows = total // _LANE
    # Dtype-aware tile: multiple of the sublane pack factor, capped so the
    # double-buffered in+out working set stays tiny (<= ~2 MiB f32) on every
    # TPU generation, but large enough to amortize ~0.35 us per grid step.
    tile_rows = min(max_tile_rows, rows)
    tile_rows -= tile_rows % sub
    slab = x.reshape(rows, _LANE)

    grid = (pl.cdiv(rows, tile_rows),)
    copied = pl.pallas_call(
        _copy_kernel,
        out_shape=jax.ShapeDtypeStruct((rows, _LANE), x.dtype),
        grid_spec=pltpu.PrefetchScalarGridSpec(
            num_scalar_prefetch=0,
            grid=grid,
            in_specs=[pl.BlockSpec((tile_rows, _LANE), lambda i: (i, 0))],
            out_specs=pl.BlockSpec((tile_rows, _LANE), lambda i: (i, 0)),
        ),
        compiler_params=pltpu.CompilerParams(
            dimension_semantics=("parallel",),
        ),
        cost_estimate=pl.CostEstimate(
            flops=0,
            transcendentals=0,
            bytes_accessed=2 * total * itemsize,
        ),
    )(slab)

    # Target view on the already-copied buffer (metadata only, no extra pass).
    return copied.reshape(out_shape)


class Reshape:
    """JAX/Pallas port of the PyTorch Reshape module."""

    def __init__(self, *args):
        self.shape = args

    def __call__(self, x):
        return pallas_reshape(x, self.shape)


if __name__ == "__main__":
    key = jax.random.PRNGKey(0)

    # Small NCHW input consistent with the dsprites discriminator usage
    # (flattening conv features before the linear head).
    B, C, H, W = 2, 4, 16, 16
    x = jax.random.normal(key, (B, C, H, W), dtype=jnp.float32)

    reshape_mod = Reshape(-1, C * H * W)  # -> (2, 1024), Pallas copy path
    y = jax.block_until_ready(reshape_mod(x))

    ref = x.reshape(-1, C * H * W)
    assert y.shape == ref.shape and y.dtype == ref.dtype
    assert bool(jnp.all(y == ref))

    # Ragged shape exercises the metadata-only fallback path.
    x2 = jax.random.normal(key, (3, 5, 7), dtype=jnp.float32)
    y2 = jax.block_until_ready(Reshape(-1)(x2))
    assert y2.shape == (105,) and bool(jnp.all(y2 == x2.reshape(-1)))

    print("KERNEL_OK")
</pallas_src>

<mosaic_0001>
module attributes {stable_mosaic.version = 11 : i64} {
  func.func @_copy_kernel(%arg0: i32, %arg1: memref<16x128xf32, #tpu.memory_space<vmem>>, %arg2: memref<16x128xf32, #tpu.memory_space<vmem>>) attributes {dimension_semantics = [#tpu.dimension_semantics<parallel>], iteration_bounds = array<i64: 1>, scalar_prefetch = 0 : i64, scratch_operands = 0 : i64, tpu.core_type = #tpu.core_type<tc>, window_params = [{transform_indices = @transform_0, window_bounds = array<i64: 16, 128>}, {transform_indices = @transform_1, window_bounds = array<i64: 16, 128>}]} {
    %c0 = arith.constant 0 : index
    %c0_0 = arith.constant 0 : index
    %0 = vector.load %arg1[%c0, %c0_0] : memref<16x128xf32, #tpu.memory_space<vmem>>, vector<16x128xf32>
    %c0_1 = arith.constant 0 : index
    %c0_2 = arith.constant 0 : index
    %1 = vector.load %arg2[%c0_1, %c0_2] : memref<16x128xf32, #tpu.memory_space<vmem>>, vector<16x128xf32>
    tpu.vector_store %arg2[%c0_1, %c0_2], %0 {strides = array<i32>} : memref<16x128xf32, #tpu.memory_space<vmem>>, vector<16x128xf32>,
    return
  }
  func.func @transform_0(%arg0: i32) -> (i32, i32) {
    %c0_i32 = arith.constant 0 : i32
    %c0_i32_0 = arith.constant 0 : i32
    return %arg0, %c0_i32 : i32, i32
  }
  func.func @transform_1(%arg0: i32) -> (i32, i32) {
    %c0_i32 = arith.constant 0 : i32
    %c0_i32_0 = arith.constant 0 : i32
    return %arg0, %c0_i32 : i32, i32
  }
}

</mosaic_0001>

<bundles_post_ra>
// kernel: tpu_custom_call.1
= control target key start
LH: loop header
LB: loop body
LE: loop exit
PB: predicated region body
PF: predicated region fallthrough
CT: control target
= control target key end

     0   :  { %6 = vsyncpa [#allocation3], 0  ;;  %s134_s0 = inlined_call_operand.hbm [shape: f32[16,128], index: 0, kind: input, shape index: {}]   ;;  %s135_s1 = inlined_call_operand.hbm [shape: f32[16,128], index: 1, kind: output, shape index: {}]  }
   0x1   :  { %7 = vsyncpa [#allocation4], 0  ;;  %s96_s6 = smov [#allocation2]   ;;  %s48_s10 = scalar_lea.hbm %s134_s0, 256 }
   0x2   :  { %s13_s7 = sshll.u32 %s96_s6, 4  ;;  %p49_p0 = scmp.ne.s32.totalorder %s134_s0, %s48_s10  ;;  %s14_s7 = int_to_ptr.vmem [resolvable:$true] %s13_s7 }
   0x3   :  { %p52_p1 = scmp.lt.u32.totalorder %s48_s10, %s134_s0 }
   0x5   :  { %p54_p2 = pnand %p52_p1, %p49_p0 }
   0x7   :  { %57 = shalt.err (!%p54_p2)
}
   0x8   :  { %s58_s15 = scalar_lea.vmem %s14_s7, 256  ;;  %p63_p4 = scmp.lt.s32.totalorder %s14_s7, %s14_s7 }
   0x9   :  { %p59_p3 = scmp.ne.s32.totalorder %s14_s7, %s58_s15  ;;  %p64_p5 = scmp.lt.s32.totalorder %s58_s15, %s58_s15 }
   0xb   :  { %p65_p6 = por %p64_p5, %p63_p4 }
   0xd   :  { %p66_p7 = pnand %p65_p6, %p59_p3 }
   0xf   :  { %69 = shalt.err (!%p66_p7)
}
  0x10   :  { %s97_s16 = smov 128   ;;  %s98_s17 = smov 8  }
  0x11   :  { %19 = dma.hbm_to_vmem [thread:$0]  %s134_s0, 256, %s14_s7, [#allocation3], %s97_s16, %s97_s16, %s98_s17  }
  0x12   :  { %92 = dma.done.wait [#allocation3], 256  }
  0x13   :  { %93 = vsyncadd [#allocation3], 4294967040  ;;  %s99_s20 = smov [#allocation5]   ;;  %v23_v0 = vld [vmem:[#allocation2] sm:$0xff]  ;;  %v24_v1 = vld [vmem:[#allocation2 + $0x8] sm:$0xff] }
  0x14   :  { %s32_s21 = sshll.u32 %s99_s20, 4  ;;  %25 = vst [vmem:[#allocation5] sm:$0xff] %v23_v0  ;;  %26 = vst [vmem:[#allocation5 + $0x8] sm:$0xff] %v24_v1  ;;  %s33_s21 = int_to_ptr.vmem [resolvable:$true] %s32_s21 }
  0x15   :  { %s70_s22 = scalar_lea.vmem %s33_s21, 256  ;;  %p75_p9 = scmp.lt.s32.totalorder %s33_s21, %s33_s21 }
  0x16   :  { %p71_p8 = scmp.ne.s32.totalorder %s33_s21, %s70_s22  ;;  %p76_p10 = scmp.lt.s32.totalorder %s70_s22, %s70_s22 }
  0x18   :  { %p77_p11 = por %p76_p10, %p75_p9 }
  0x1a   :  { %p78_p12 = pnand %p77_p11, %p71_p8 }
  0x1c   :  { %81 = shalt.err (!%p78_p12)
}
  0x1d   :  { %s82_s0 = scalar_lea.hbm %s135_s1, 256 }
  0x1e   :  { %p83_p13 = scmp.ne.s32.totalorder %s135_s1, %s82_s0  ;;  %p86_p0 = scmp.lt.u32.totalorder %s82_s0, %s135_s1 }
  0x20   :  { %p88_p1 = pnand %p86_p0, %p83_p13 }
  0x22   :  { %91 = shalt.err (!%p88_p1)
}
  0x23   :  { %38 = dma.vmem_to_hbm [thread:$0]  %s33_s21, 256, %s135_s1, [#allocation4], %s97_s16, %s97_s16, %s98_s17  }
  0x24   :  { %94 = dma.done.wait [#allocation4], 256  }
  0x25   :  { %95 = vsyncadd [#allocation4], 4294967040 }
  0x26   :  { %42 = vsyncpa [#allocation3], 1 }
  0x27   :  { %43 = vsyncpa [#allocation4], 1 }

</bundles_post_ra>
